<compile_context>
chip_gen: v7x
topology: tpu7x:2x2x1
jax: 0.10.0
libtpu: 0.0.40
codegen_flags: <defaults>
</compile_context>

<pallas_src>
import jax
import jax.numpy as jnp
from jax.experimental import pallas as pl
from jax.experimental.pallas import tpu as pltpu

# SimulationParams(6, 4, 2, 2, 2, 1, 20, 100, 0.008) -> nqv = 4
NQV = 4                     # n_in passed to NNValueFunction
H1 = 200                    # logical hidden widths (torch module)
H2 = 500
H1P = 256                   # lane-aligned padded widths used inside the kernel
H2P = 512
SOFTPLUS_BETA = 5.0
SOFTPLUS_THRESHOLD = 20.0   # torch.nn.Softplus default threshold


def _softplus_beta(x):
    """torch Softplus(beta=5): (1/beta)*log1p(exp(beta*x)), linear past threshold.

    exp() argument is clamped so the unselected branch never overflows.
    """
    bx = SOFTPLUS_BETA * x
    soft = jnp.log1p(jnp.exp(jnp.minimum(bx, SOFTPLUS_THRESHOLD))) / SOFTPLUS_BETA
    return jnp.where(bx > SOFTPLUS_THRESHOLD, x, soft)


def _mlp_kernel(t_ref, x_ref, w1_ref, b1_ref, w2_ref, b2_ref, w3_ref, b3_ref, o_ref):
    t = t_ref[0]                                              # SMEM scalar

    # ---- layer 1 on the VPU (K = 5 would waste the MXU contraction dim) ----
    # time column is the constant t for every row -> fold into the bias.
    h1 = b1_ref[...] + t * w1_ref[pl.ds(NQV, 1), :]           # (1, H1P)
    x = x_ref[...]                                            # (TB, NQV)
    for k in range(NQV):
        h1 = h1 + x[:, k:k + 1] * w1_ref[pl.ds(k, 1), :]      # (TB, H1P)
    h1 = _softplus_beta(h1)

    # ---- layer 2: the only real matmul (256 x 512) -> MXU ----
    h2 = jnp.dot(h1, w2_ref[...], preferred_element_type=jnp.float32) + b2_ref[...]
    h2 = _softplus_beta(h2)                                   # (TB, H2P)

    # ---- layer 3 (N = 1) as VPU multiply + lane reduction (skip MXU) ----
    o = jnp.sum(h2 * w3_ref[...], axis=-1, keepdims=True) + b3_ref[0]
    o_ref[...] = o                                            # (TB, 1)


def _round_up(n, m):
    return ((n + m - 1) // m) * m


def nn_value_function_forward(t, x, kernel_params):
    """Mirrors NNValueFunction.forward(t, x). Returns (b, 1, 1).

    kernel_params are the padded, kernel-ready params from prepare_kernel_params.
    """
    w1p, b1p, w2p, b2p, w3p, b3p = kernel_params
    x2 = x.reshape(x.shape[0], NQV).astype(jnp.float32)
    b = x2.shape[0]

    tb = min(512, _round_up(b, 8))            # batch block (sublane-aligned)
    grid = (pl.cdiv(b, tb),)
    t_arr = jnp.asarray([t], dtype=jnp.float32)

    out = pl.pallas_call(
        _mlp_kernel,
        out_shape=jax.ShapeDtypeStruct((b, 1), jnp.float32),
        grid=grid,
        in_specs=[
            pl.BlockSpec(memory_space=pltpu.MemorySpace.SMEM),      # t        (1,)
            pl.BlockSpec((tb, NQV), lambda i: (i, 0)),              # x        (B, NQV)
            pl.BlockSpec((NQV + 1, H1P), lambda i: (0, 0)),         # w1       (5, 256)
            pl.BlockSpec((1, H1P), lambda i: (0, 0)),               # b1       (1, 256)
            pl.BlockSpec((H1P, H2P), lambda i: (0, 0)),             # w2       (256, 512)
            pl.BlockSpec((1, H2P), lambda i: (0, 0)),               # b2       (1, 512)
            pl.BlockSpec((1, H2P), lambda i: (0, 0)),               # w3 row   (1, 512)
            pl.BlockSpec(memory_space=pltpu.MemorySpace.SMEM),      # b3       (1,)
        ],
        out_specs=pl.BlockSpec((tb, 1), lambda i: (i, 0)),
        compiler_params=pltpu.CompilerParams(
            dimension_semantics=("parallel",),
            vmem_limit_bytes=32 * 1024 * 1024,
        ),
    )(t_arr, x2, w1p, b1p, w2p, b2p, w3p, b3p)
    return out.reshape(b, 1, 1)


def init_params(key):
    """Logical (unpadded) params matching the module's __init__:
    xavier_uniform_ for weights, uniform_(0, 1) for biases.
    Weights stored as (in, out) so forward computes x @ W."""
    def xavier_uniform(k, fan_in, fan_out):
        bound = jnp.sqrt(6.0 / (fan_in + fan_out))
        return jax.random.uniform(k, (fan_in, fan_out), jnp.float32, -bound, bound)

    k1, k2, k3, k4, k5, k6 = jax.random.split(key, 6)
    w1 = xavier_uniform(k1, NQV + 1, H1)
    b1 = jax.random.uniform(k2, (H1,), jnp.float32, 0.0, 1.0)
    w2 = xavier_uniform(k3, H1, H2)
    b2 = jax.random.uniform(k4, (H2,), jnp.float32, 0.0, 1.0)
    w3 = xavier_uniform(k5, H2, 1)
    b3 = jax.random.uniform(k6, (1,), jnp.float32, 0.0, 1.0)
    return (w1, b1, w2, b2, w3, b3)


def prepare_kernel_params(params):
    """Zero-pad hidden widths to lane-aligned 256/512 once, outside the hot path.

    Padded bias lanes and padded next-layer weight rows are zero, so padded
    lanes (softplus(0) != 0) never reach the output."""
    w1, b1, w2, b2, w3, b3 = params
    w1p = jnp.zeros((NQV + 1, H1P), jnp.float32).at[:, :H1].set(w1)
    b1p = jnp.zeros((1, H1P), jnp.float32).at[:, :H1].set(b1.reshape(1, H1))
    w2p = jnp.zeros((H1P, H2P), jnp.float32).at[:H1, :H2].set(w2)
    b2p = jnp.zeros((1, H2P), jnp.float32).at[:, :H2].set(b2.reshape(1, H2))
    w3p = jnp.zeros((1, H2P), jnp.float32).at[:, :H2].set(w3.reshape(1, H2))
    b3p = b3.reshape(1).astype(jnp.float32)
    return (w1p, b1p, w2p, b2p, w3p, b3p)


def _reference_forward(t, x, params):
    """Pure-JAX reference on the logical (unpadded) params."""
    w1, b1, w2, b2, w3, b3 = params
    x2 = x.reshape(x.shape[0], NQV).astype(jnp.float32)
    b = x2.shape[0]
    aug = jnp.concatenate([x2, jnp.full((b, 1), t, jnp.float32)], axis=1)
    hp = jax.lax.Precision.HIGHEST
    h1 = _softplus_beta(jnp.dot(aug, w1, precision=hp) + b1)
    h2 = _softplus_beta(jnp.dot(h1, w2, precision=hp) + b2)
    return (jnp.dot(h2, w3, precision=hp) + b3).reshape(b, 1, 1)


if __name__ == "__main__":
    key = jax.random.PRNGKey(0)
    k_params, k_x = jax.random.split(key)
    params = init_params(k_params)
    kparams = prepare_kernel_params(params)     # pad once; reuse across timesteps

    batch = 8
    # x arrives as (batch, 1, nqv) state slices; forward reshapes to (batch, NQV).
    x = jax.random.normal(k_x, (batch, 1, NQV), dtype=jnp.float32)
    t = 0.008 * 3  # some time point

    out = nn_value_function_forward(t, x, kparams)
    out = jax.block_until_ready(out)

    ref = _reference_forward(t, x, params)
    assert out.shape == (batch, 1, 1)
    assert jnp.allclose(out, ref, atol=1e-3, rtol=1e-3), \
        f"max abs err {jnp.max(jnp.abs(out - ref))}"

    print("KERNEL_OK")
</pallas_src>

<mosaic_0001>
module attributes {stable_mosaic.version = 11 : i64} {
  func.func @_mlp_kernel(%arg0: i32, %arg1: memref<1xf32, #tpu.memory_space<smem>>, %arg2: memref<8x4xf32, #tpu.memory_space<vmem>>, %arg3: memref<5x256xf32, #tpu.memory_space<vmem>>, %arg4: memref<1x256xf32, #tpu.memory_space<vmem>>, %arg5: memref<256x512xf32, #tpu.memory_space<vmem>>, %arg6: memref<1x512xf32, #tpu.memory_space<vmem>>, %arg7: memref<1x512xf32, #tpu.memory_space<vmem>>, %arg8: memref<1xf32, #tpu.memory_space<smem>>, %arg9: memref<8x1xf32, #tpu.memory_space<vmem>>) attributes {dimension_semantics = [#tpu.dimension_semantics<parallel>], iteration_bounds = array<i64: 1>, scalar_prefetch = 0 : i64, scratch_operands = 0 : i64, tpu.core_type = #tpu.core_type<tc>, window_params = [{transform_indices = @transform_0, window_bounds = array<i64: 1>}, {transform_indices = @transform_1, window_bounds = array<i64: 8, 4>}, {pipeline_mode = #tpu.pipeline_mode<synchronous>, transform_indices = @transform_2, window_bounds = array<i64: 5, 256>}, {pipeline_mode = #tpu.pipeline_mode<synchronous>, transform_indices = @transform_3, window_bounds = array<i64: 1, 256>}, {pipeline_mode = #tpu.pipeline_mode<synchronous>, transform_indices = @transform_4, window_bounds = array<i64: 256, 512>}, {pipeline_mode = #tpu.pipeline_mode<synchronous>, transform_indices = @transform_5, window_bounds = array<i64: 1, 512>}, {pipeline_mode = #tpu.pipeline_mode<synchronous>, transform_indices = @transform_6, window_bounds = array<i64: 1, 512>}, {transform_indices = @transform_7, window_bounds = array<i64: 1>}, {transform_indices = @transform_8, window_bounds = array<i64: 8, 1>}]} {
    %c0 = arith.constant 0 : index
    %0 = memref.load %arg1[%c0] : memref<1xf32, #tpu.memory_space<smem>>
    %c0_0 = arith.constant 0 : index
    %c0_1 = arith.constant 0 : index
    %1 = vector.load %arg4[%c0_0, %c0_1] : memref<1x256xf32, #tpu.memory_space<vmem>>, vector<1x256xf32>
    %c4 = arith.constant 4 : index
    %c0_2 = arith.constant 0 : index
    %2 = vector.load %arg3[%c4, %c0_2] : memref<5x256xf32, #tpu.memory_space<vmem>>, vector<1x256xf32>
    %3 = vector.broadcast %0 : f32 to vector<1x256xf32>
    %4 = arith.mulf %3, %2 : vector<1x256xf32>
    %5 = arith.addf %1, %4 : vector<1x256xf32>
    %c0_3 = arith.constant 0 : index
    %c0_4 = arith.constant 0 : index
    %6 = vector.load %arg2[%c0_3, %c0_4] : memref<8x4xf32, #tpu.memory_space<vmem>>, vector<8x4xf32>
    %7 = vector.extract_strided_slice %6 {offsets = [0, 0], sizes = [8, 1], strides = [1, 1]} : vector<8x4xf32> to vector<8x1xf32>
    %c0_5 = arith.constant 0 : index
    %c0_6 = arith.constant 0 : index
    %8 = vector.load %arg3[%c0_5, %c0_6] : memref<5x256xf32, #tpu.memory_space<vmem>>, vector<1x256xf32>
    %9 = vector.broadcast %7 : vector<8x1xf32> to vector<8x256xf32>
    %10 = vector.broadcast %8 : vector<1x256xf32> to vector<8x256xf32>
    %11 = arith.mulf %9, %10 : vector<8x256xf32>
    %12 = vector.broadcast %5 : vector<1x256xf32> to vector<8x256xf32>
    %13 = arith.addf %12, %11 : vector<8x256xf32>
    %14 = vector.extract_strided_slice %6 {offsets = [0, 1], sizes = [8, 1], strides = [1, 1]} : vector<8x4xf32> to vector<8x1xf32>
    %c1 = arith.constant 1 : index
    %c0_7 = arith.constant 0 : index
    %15 = vector.load %arg3[%c1, %c0_7] : memref<5x256xf32, #tpu.memory_space<vmem>>, vector<1x256xf32>
    %16 = vector.broadcast %14 : vector<8x1xf32> to vector<8x256xf32>
    %17 = vector.broadcast %15 : vector<1x256xf32> to vector<8x256xf32>
    %18 = arith.mulf %16, %17 : vector<8x256xf32>
    %19 = arith.addf %13, %18 : vector<8x256xf32>
    %20 = vector.extract_strided_slice %6 {offsets = [0, 2], sizes = [8, 1], strides = [1, 1]} : vector<8x4xf32> to vector<8x1xf32>
    %c2 = arith.constant 2 : index
    %c0_8 = arith.constant 0 : index
    %21 = vector.load %arg3[%c2, %c0_8] : memref<5x256xf32, #tpu.memory_space<vmem>>, vector<1x256xf32>
    %22 = vector.broadcast %20 : vector<8x1xf32> to vector<8x256xf32>
    %23 = vector.broadcast %21 : vector<1x256xf32> to vector<8x256xf32>
    %24 = arith.mulf %22, %23 : vector<8x256xf32>
    %25 = arith.addf %19, %24 : vector<8x256xf32>
    %26 = vector.extract_strided_slice %6 {offsets = [0, 3], sizes = [8, 1], strides = [1, 1]} : vector<8x4xf32> to vector<8x1xf32>
    %c3 = arith.constant 3 : index
    %c0_9 = arith.constant 0 : index
    %27 = vector.load %arg3[%c3, %c0_9] : memref<5x256xf32, #tpu.memory_space<vmem>>, vector<1x256xf32>
    %28 = vector.broadcast %26 : vector<8x1xf32> to vector<8x256xf32>
    %29 = vector.broadcast %27 : vector<1x256xf32> to vector<8x256xf32>
    %30 = arith.mulf %28, %29 : vector<8x256xf32>
    %31 = arith.addf %25, %30 : vector<8x256xf32>
    %cst = arith.constant 5.000000e+00 : f32
    %32 = vector.broadcast %cst : f32 to vector<8x256xf32>
    %33 = arith.mulf %32, %31 : vector<8x256xf32>
    %cst_10 = arith.constant 2.000000e+01 : f32
    %34 = vector.broadcast %cst_10 : f32 to vector<8x256xf32>
    %35 = arith.minimumf %33, %34 : vector<8x256xf32>
    %36 = math.exp %35 : vector<8x256xf32>
    %37 = math.log1p %36 : vector<8x256xf32>
    %cst_11 = arith.constant 5.000000e+00 : f32
    %38 = vector.broadcast %cst_11 : f32 to vector<8x256xf32>
    %39 = arith.divf %37, %38 : vector<8x256xf32>
    %cst_12 = arith.constant 2.000000e+01 : f32
    %40 = vector.broadcast %cst_12 : f32 to vector<8x256xf32>
    %41 = arith.cmpf ogt, %33, %40 : vector<8x256xf32>
    %42 = arith.select %41, %31, %39 : vector<8x256xi1>, vector<8x256xf32>
    %c0_13 = arith.constant 0 : index
    %c0_14 = arith.constant 0 : index
    %43 = vector.load %arg5[%c0_13, %c0_14] : memref<256x512xf32, #tpu.memory_space<vmem>>, vector<256x512xf32>
    %cst_15 = arith.constant dense<0.000000e+00> : vector<8x512xf32>
    %44 = tpu.matmul %42, %43, %cst_15 {dimension_numbers = #tpu.dot_dimension_numbers<[1], [0], [0], [1], [0, 0, 1, 1], [], []>} : vector<8x256xf32>, vector<256x512xf32>, vector<8x512xf32> -> vector<8x512xf32>
    %c0_16 = arith.constant 0 : index
    %c0_17 = arith.constant 0 : index
    %45 = vector.load %arg6[%c0_16, %c0_17] : memref<1x512xf32, #tpu.memory_space<vmem>>, vector<1x512xf32>
    %46 = vector.broadcast %45 : vector<1x512xf32> to vector<8x512xf32>
    %47 = arith.addf %44, %46 : vector<8x512xf32>
    %cst_18 = arith.constant 5.000000e+00 : f32
    %48 = vector.broadcast %cst_18 : f32 to vector<8x512xf32>
    %49 = arith.mulf %48, %47 : vector<8x512xf32>
    %cst_19 = arith.constant 2.000000e+01 : f32
    %50 = vector.broadcast %cst_19 : f32 to vector<8x512xf32>
    %51 = arith.minimumf %49, %50 : vector<8x512xf32>
    %52 = math.exp %51 : vector<8x512xf32>
    %53 = math.log1p %52 : vector<8x512xf32>
    %cst_20 = arith.constant 5.000000e+00 : f32
    %54 = vector.broadcast %cst_20 : f32 to vector<8x512xf32>
    %55 = arith.divf %53, %54 : vector<8x512xf32>
    %cst_21 = arith.constant 2.000000e+01 : f32
    %56 = vector.broadcast %cst_21 : f32 to vector<8x512xf32>
    %57 = arith.cmpf ogt, %49, %56 : vector<8x512xf32>
    %58 = arith.select %57, %47, %55 : vector<8x512xi1>, vector<8x512xf32>
    %c0_22 = arith.constant 0 : index
    %c0_23 = arith.constant 0 : index
    %59 = vector.load %arg7[%c0_22, %c0_23] : memref<1x512xf32, #tpu.memory_space<vmem>>, vector<1x512xf32>
    %60 = vector.broadcast %59 : vector<1x512xf32> to vector<8x512xf32>
    %61 = arith.mulf %58, %60 : vector<8x512xf32>
    %cst_24 = arith.constant dense<0.000000e+00> : vector<8xf32>
    %62 = vector.multi_reduction <add>, %61, %cst_24 [1] : vector<8x512xf32> to vector<8xf32>
    %63 = vector.shape_cast %62 : vector<8xf32> to vector<8x1xf32>
    %c0_25 = arith.constant 0 : index
    %64 = memref.load %arg8[%c0_25] : memref<1xf32, #tpu.memory_space<smem>>
    %65 = vector.broadcast %64 : f32 to vector<8x1xf32>
    %66 = arith.addf %63, %65 : vector<8x1xf32>
    %c0_26 = arith.constant 0 : index
    %c0_27 = arith.constant 0 : index
    %67 = vector.load %arg9[%c0_26, %c0_27] : memref<8x1xf32, #tpu.memory_space<vmem>>, vector<8x1xf32>
    tpu.vector_store %arg9[%c0_26, %c0_27], %66 {strides = array<i32>} : memref<8x1xf32, #tpu.memory_space<vmem>>, vector<8x1xf32>,
    return
  }
  func.func @transform_0(%arg0: i32) -> i32 {
    %c0_i32 = arith.constant 0 : i32
    %c0_i32_0 = arith.constant 0 : i32
    return %c0_i32 : i32
  }
  func.func @transform_1(%arg0: i32) -> (i32, i32) {
    %c0_i32 = arith.constant 0 : i32
    %c0_i32_0 = arith.constant 0 : i32
    return %arg0, %c0_i32 : i32, i32
  }
  func.func @transform_2(%arg0: i32) -> (i32, i32) {
    %c0_i32 = arith.constant 0 : i32
    %c0_i32_0 = arith.constant 0 : i32
    %c0_i32_1 = arith.constant 0 : i32
    return %c0_i32, %c0_i32_0 : i32, i32
  }
  func.func @transform_3(%arg0: i32) -> (i32, i32) {
    %c0_i32 = arith.constant 0 : i32
    %c0_i32_0 = arith.constant 0 : i32
    %c0_i32_1 = arith.constant 0 : i32
    return %c0_i32, %c0_i32_0 : i32, i32
  }
  func.func @transform_4(%arg0: i32) -> (i32, i32) {
    %c0_i32 = arith.constant 0 : i32
    %c0_i32_0 = arith.constant 0 : i32
    %c0_i32_1 = arith.constant 0 : i32
    return %c0_i32, %c0_i32_0 : i32, i32
  }
  func.func @transform_5(%arg0: i32) -> (i32, i32) {
    %c0_i32 = arith.constant 0 : i32
    %c0_i32_0 = arith.constant 0 : i32
    %c0_i32_1 = arith.constant 0 : i32
    return %c0_i32, %c0_i32_0 : i32, i32
  }
  func.func @transform_6(%arg0: i32) -> (i32, i32) {
    %c0_i32 = arith.constant 0 : i32
    %c0_i32_0 = arith.constant 0 : i32
    %c0_i32_1 = arith.constant 0 : i32
    return %c0_i32, %c0_i32_0 : i32, i32
  }
  func.func @transform_7(%arg0: i32) -> i32 {
    %c0_i32 = arith.constant 0 : i32
    %c0_i32_0 = arith.constant 0 : i32
    return %c0_i32 : i32
  }
  func.func @transform_8(%arg0: i32) -> (i32, i32) {
    %c0_i32 = arith.constant 0 : i32
    %c0_i32_0 = arith.constant 0 : i32
    return %arg0, %c0_i32 : i32, i32
  }
}

</mosaic_0001>

<bundles_post_ra>
// kernel: tpu_custom_call.1
= control target key start
LH: loop header
LB: loop body
LE: loop exit
PB: predicated region body
PF: predicated region fallthrough
CT: control target
= control target key end

     0   :  { %15 = vsyncpa [#allocation5], 0  ;;  %s770_s27 = smov [#allocation4]   ;;  %s934_s0 = inlined_call_operand.<no memory space> [shape: f32[1], index: 0, kind: input, shape index: {}]   ;;  %s935_s1 = inlined_call_operand.vmem [shape: f32[8,4], index: 1, kind: input, shape index: {}]   ;;  %s936_s2 = inlined_call_operand.vmem [shape: f32[5,256], index: 2, kind: input, shape index: {}]   ;;  %s937_s3 = inlined_call_operand.vmem [shape: f32[1,256], index: 3, kind: input, shape index: {}]   ;;  %s938_s4 = inlined_call_operand.hbm [shape: f32[256,512], index: 4, kind: input, shape index: {}]   ;;  %s939_s5 = inlined_call_operand.vmem [shape: f32[1,512], index: 5, kind: input, shape index: {}]   ;;  %s940_s6 = inlined_call_operand.vmem [shape: f32[1,512], index: 6, kind: input, shape index: {}]   ;;  %s941_s7 = inlined_call_operand.<no memory space> [shape: f32[1], index: 7, kind: input, shape index: {}]   ;;  %s942_s8 = inlined_call_operand.vmem [shape: f32[8,1], index: 8, kind: output, shape index: {}]  }
   0x1   :  { %s29_s28 = sshll.u32 %s770_s27, 4  ;;  %s746_s9 = scalar_lea.hbm %s938_s4, 16384  ;;  %s30_s28 = int_to_ptr.vmem [resolvable:$true] %s29_s28 }
   0x2   :  { %p747_p0 = scmp.ne.s32.totalorder %s938_s4, %s746_s9  ;;  %p750_p1 = scmp.lt.u32.totalorder %s746_s9, %s938_s4 }
   0x4   :  { %p752_p2 = pnand %p750_p1, %p747_p0 }
   0x6   :  { %755 = shalt.err (!%p752_p2)
}
   0x7   :  { %s756_s14 = scalar_lea.vmem %s30_s28, 16384  ;;  %p761_p4 = scmp.lt.s32.totalorder %s30_s28, %s30_s28 }
   0x8   :  { %p757_p3 = scmp.ne.s32.totalorder %s30_s28, %s756_s14  ;;  %p762_p5 = scmp.lt.s32.totalorder %s756_s14, %s756_s14 }
   0xa   :  { %p763_p6 = por %p762_p5, %p761_p4 }
   0xc   :  { %p764_p7 = pnand %p763_p6, %p757_p3 }
   0xe   :  { %767 = shalt.err (!%p764_p7)
}
   0xf   :  { %s771_s15 = smov 512   ;;  %s772_s16 = smov 32  }
  0x10   :  { %35 = dma.hbm_to_vmem [thread:$0]  %s938_s4, 16384, %s30_s28, [#allocation5], %s771_s15, %s771_s15, %s772_s16  }
  0x11   :  { %768 = dma.done.wait [#allocation5], 16384  }
  0x12   :  { %769 = vsyncadd [#allocation5], 4294950912  ;;  %v773_v0 = vmov 0   ;;  %v774_v1 = vmov 2   ;;  %v52_v2 = vld [vmem:[%s935_s1] sm:$0xff]  ;;  %v182_v3 = vld [vmem:[#allocation4 + $0x8] sm:$0xff] }
  0x13   :  { %717 = vset.pattern.permute.xlu0 %v773_v0  ;;  %719 = vset.pattern.permute.xlu1 %v774_v1  ;;  %v186_v4 = vld [vmem:[#allocation4 + $0x28] sm:$0xff]  ;;  %v184_v6 = vld [vmem:[#allocation4 + $0x18] sm:$0xff]  ;;  %v181_v8 = vld [vmem:[#allocation4] sm:$0xff]  ;;  %v775_v22 = vmov 1   ;;  %v776_v23 = vmov 3   ;;  %vm571_vm12 = vcmask 7168  }
  0x14   :  { %56 = vperm.xlu0 %717, %v52_v2   ;;  %109 = vperm.xlu1 %719, %v52_v2   ;;  %v582_v5 = vpack.c.bf16 %v186_v4, %v182_v3  ;;  %v188_v7 = vld [vmem:[#allocation4 + $0x38] sm:$0xff]  ;;  %v185_v10 = vld [vmem:[#allocation4 + $0x20] sm:$0xff]  ;;  %v183_v11 = vld [vmem:[#allocation4 + $0x10] sm:$0xff] }
  0x15   :  { %v646_v9 = vpack.c.bf16 %v188_v7, %v184_v6  ;;  %v187_v12 = vld [vmem:[#allocation4 + $0x30] sm:$0xff]  ;;  %v584_v13 = vpack.c.bf16 %v185_v10, %v181_v8  ;;  %v190_v15 = vld [vmem:[#allocation4 + $0x48] sm:$0xff]  ;;  %v192_v17 = vld [vmem:[#allocation4 + $0x58] sm:$0xff] }
  0x16   :  { %583 = vmatprep.subr.bf16.mxu0 %v582_v5  ;;  %v648_v14 = vpack.c.bf16 %v187_v12, %v183_v11  ;;  %v194_v16 = vld [vmem:[#allocation4 + $0x68] sm:$0xff]  ;;  %v196_v19 = vld [vmem:[#allocation4 + $0x78] sm:$0xff]  ;;  %v189_v20 = vld [vmem:[#allocation4 + $0x40] sm:$0xff] }
  0x17   :  { %647 = vmatprep.subr.bf16.mxu1 %v646_v9  ;;  %v586_v18 = vpack.c.bf16 %v194_v16, %v190_v15  ;;  %v193_v21 = vld [vmem:[#allocation4 + $0x60] sm:$0xff]  ;;  %v650_v24 = vpack.c.bf16 %v196_v19, %v192_v17  ;;  %v191_v25 = vld [vmem:[#allocation4 + $0x50] sm:$0xff]  ;;  %v198_v27 = vld [vmem:[#allocation4 + $0x88] sm:$0xff]  ;;  %585 = vmatpush1.bf16.msra.mxu0 %v584_v13 }
  0x18   :  { %718 = vset.pattern.permute.xlu0 %v775_v22  ;;  %720 = vset.pattern.permute.xlu1 %v776_v23  ;;  %v195_v26 = vld [vmem:[#allocation4 + $0x70] sm:$0xff]  ;;  %v202_v28 = vld [vmem:[#allocation4 + $0xa8] sm:$0xff]  ;;  %v200_v29 = vld [vmem:[#allocation4 + $0x98] sm:$0xff]  ;;  %v588_v31 = vpack.c.bf16 %v193_v21, %v189_v20 }
  0x19   :  { %88 = vperm.xlu0 %718, %v52_v2   ;;  %130 = vperm.xlu1 %720, %v52_v2   ;;  %v204_v30 = vld [vmem:[#allocation4 + $0xb8] sm:$0xff]  ;;  %v652_v32 = vpack.c.bf16 %v195_v26, %v191_v25  ;;  %v197_v33 = vld [vmem:[#allocation4 + $0x80] sm:$0xff]  ;;  %v590_v35 = vpack.c.bf16 %v202_v28, %v198_v27  ;;  %v199_v37 = vld [vmem:[#allocation4 + $0x90] sm:$0xff] }
  0x1a   :  { %649 = vmatpush1.bf16.msra.mxu1 %v648_v14  ;;  %v201_v34 = vld [vmem:[#allocation4 + $0xa0] sm:$0xff]  ;;  %587 = vmatprep.subr.bf16.mxu0 %v586_v18  ;;  %v654_v36 = vpack.c.bf16 %v204_v30, %v200_v29  ;;  %v203_v38 = vld [vmem:[#allocation4 + $0xb0] sm:$0xff]  ;;  %v206_v39 = vld [vmem:[#allocation4 + $0xc8] sm:$0xff] }
  0x1b   :  { %651 = vmatprep.subr.bf16.mxu1 %v650_v24  ;;  %v210_v40 = vld [vmem:[#allocation4 + $0xe8] sm:$0xff]  ;;  %v208_v41 = vld [vmem:[#allocation4 + $0xd8] sm:$0xff]  ;;  %589 = vmatpush1.bf16.msra.mxu0 %v588_v31  ;;  %v592_v43 = vpack.c.bf16 %v201_v34, %v197_v33  ;;  %v656_v44 = vpack.c.bf16 %v203_v38, %v199_v37  ;;  %v205_v45 = vld [vmem:[#allocation4 + $0xc0] sm:$0xff] }
  0x1c   :  { %v212_v42 = vld [vmem:[#allocation4 + $0xf8] sm:$0xff]  ;;  %v209_v46 = vld [vmem:[#allocation4 + $0xe0] sm:$0xff]  ;;  %591 = vmatprep.subr.bf16.mxu0 %v590_v35  ;;  %v594_v47 = vpack.c.bf16 %v210_v40, %v206_v39  ;;  %v207_v49 = vld [vmem:[#allocation4 + $0xd0] sm:$0xff] }
  0x1d   :  { %721 = vset.pattern.permute.xlu0 %v776_v23  ;;  %v658_v48 = vpack.c.bf16 %v212_v42, %v208_v41  ;;  %v211_v50 = vld [vmem:[#allocation4 + $0xf0] sm:$0xff]  ;;  %v214_v51 = vld [vmem:[#allocation4 + $0x108] sm:$0xff]  ;;  %v216_v53 = vld [vmem:[#allocation4 + $0x118] sm:$0xff]  ;;  %v596_v55 = vpack.c.bf16 %v209_v46, %v205_v45 }
  0x1e   :  { %653 = vmatpush1.bf16.msra.mxu1 %v652_v32  ;;  %v218_v52 = vld [vmem:[#allocation4 + $0x128] sm:$0xff]  ;;  %v220_v54 = vld [vmem:[#allocation4 + $0x138] sm:$0xff]  ;;  %v660_v56 = vpack.c.bf16 %v211_v50, %v207_v49  ;;  %v213_v57 = vld [vmem:[#allocation4 + $0x100] sm:$0xff] }
  0x1f   :  { %655 = vmatprep.subr.bf16.mxu1 %v654_v36  ;;  %593 = vmatpush1.bf16.msra.mxu0 %v592_v43  ;;  %v217_v58 = vld [vmem:[#allocation4 + $0x120] sm:$0xff]  ;;  %v598_v59 = vpack.c.bf16 %v218_v52, %v214_v51  ;;  %v662_v60 = vpack.c.bf16 %v220_v54, %v216_v53  ;;  %v215_v61 = vld [vmem:[#allocation4 + $0x110] sm:$0xff]  ;;  %v222_v63 = vld [vmem:[#allocation4 + $0x148] sm:$0xff] }
  0x20   :  { %595 = vmatprep.subr.bf16.mxu0 %v594_v47  ;;  %v219_v62 = vld [vmem:[#allocation4 + $0x130] sm:$0xff]  ;;  %v226_v0 = vld [vmem:[#allocation4 + $0x168] sm:$0xff]  ;;  %v224_v1 = vld [vmem:[#allocation4 + $0x158] sm:$0xff]  ;;  %v600_v3 = vpack.c.bf16 %v217_v58, %v213_v57 }
  0x21   :  { %v228_v2 = vld [vmem:[#allocation4 + $0x178] sm:$0xff]  ;;  %v664_v4 = vpack.c.bf16 %v219_v62, %v215_v61  ;;  %v221_v5 = vld [vmem:[#allocation4 + $0x140] sm:$0xff]  ;;  %v602_v7 = vpack.c.bf16 %v226_v0, %v222_v63  ;;  %v223_v9 = vld [vmem:[#allocation4 + $0x150] sm:$0xff] }
  0x22   :  { %657 = vmatpush1.bf16.msra.mxu1 %v656_v44  ;;  %v225_v6 = vld [vmem:[#allocation4 + $0x160] sm:$0xff]  ;;  %v666_v8 = vpack.c.bf16 %v228_v2, %v224_v1  ;;  %v227_v10 = vld [vmem:[#allocation4 + $0x170] sm:$0xff]  ;;  %v230_v11 = vld [vmem:[#allocation4 + $0x188] sm:$0xff] }
  0x23   :  { %659 = vmatprep.subr.bf16.mxu1 %v658_v48  ;;  %597 = vmatpush1.bf16.msra.mxu0 %v596_v55  ;;  %v234_v12 = vld [vmem:[#allocation4 + $0x1a8] sm:$0xff]  ;;  %v232_v13 = vld [vmem:[#allocation4 + $0x198] sm:$0xff]  ;;  %v604_v15 = vpack.c.bf16 %v225_v6, %v221_v5  ;;  %v668_v16 = vpack.c.bf16 %v227_v10, %v223_v9  ;;  %v229_v17 = vld [vmem:[#allocation4 + $0x180] sm:$0xff] }
  0x24   :  { %599 = vmatprep.subr.bf16.mxu0 %v598_v59  ;;  %v236_v14 = vld [vmem:[#allocation4 + $0x1b8] sm:$0xff]  ;;  %v233_v18 = vld [vmem:[#allocation4 + $0x1a0] sm:$0xff]  ;;  %v606_v19 = vpack.c.bf16 %v234_v12, %v230_v11  ;;  %v231_v21 = vld [vmem:[#allocation4 + $0x190] sm:$0xff] }
  0x25   :  { %v670_v20 = vpack.c.bf16 %v236_v14, %v232_v13  ;;  %v235_v22 = vld [vmem:[#allocation4 + $0x1b0] sm:$0xff]  ;;  %v238_v23 = vld [vmem:[#allocation4 + $0x1c8] sm:$0xff]  ;;  %v240_v25 = vld [vmem:[#allocation4 + $0x1d8] sm:$0xff]  ;;  %v608_v27 = vpack.c.bf16 %v233_v18, %v229_v17 }
  0x26   :  { %661 = vmatpush1.bf16.msra.mxu1 %v660_v56  ;;  %v242_v24 = vld [vmem:[#allocation4 + $0x1e8] sm:$0xff]  ;;  %v244_v26 = vld [vmem:[#allocation4 + $0x1f8] sm:$0xff]  ;;  %v672_v28 = vpack.c.bf16 %v235_v22, %v231_v21  ;;  %v237_v29 = vld [vmem:[#allocation4 + $0x1c0] sm:$0xff] }
  0x27   :  { %663 = vmatprep.subr.bf16.mxu1 %v662_v60  ;;  %601 = vmatpush1.bf16.msra.mxu0 %v600_v3  ;;  %v241_v30 = vld [vmem:[#allocation4 + $0x1e0] sm:$0xff]  ;;  %v610_v31 = vpack.c.bf16 %v242_v24, %v238_v23  ;;  %v674_v32 = vpack.c.bf16 %v244_v26, %v240_v25  ;;  %v239_v33 = vld [vmem:[#allocation4 + $0x1d0] sm:$0xff]  ;;  %v246_v35 = vld [vmem:[#allocation4 + $0x208] sm:$0xff] }
  0x28   :  { %603 = vmatprep.subr.bf16.mxu0 %v602_v7  ;;  %v243_v34 = vld [vmem:[#allocation4 + $0x1f0] sm:$0xff]  ;;  %v250_v36 = vld [vmem:[#allocation4 + $0x228] sm:$0xff]  ;;  %v248_v37 = vld [vmem:[#allocation4 + $0x218] sm:$0xff]  ;;  %v612_v39 = vpack.c.bf16 %v241_v30, %v237_v29 }
  0x29   :  { %v252_v38 = vld [vmem:[#allocation4 + $0x238] sm:$0xff]  ;;  %v676_v40 = vpack.c.bf16 %v243_v34, %v239_v33  ;;  %v245_v41 = vld [vmem:[#allocation4 + $0x200] sm:$0xff]  ;;  %v614_v43 = vpack.c.bf16 %v250_v36, %v246_v35  ;;  %v247_v45 = vld [vmem:[#allocation4 + $0x210] sm:$0xff] }
  0x2a   :  { %665 = vmatpush1.bf16.msra.mxu1 %v664_v4  ;;  %v249_v42 = vld [vmem:[#allocation4 + $0x220] sm:$0xff]  ;;  %v678_v44 = vpack.c.bf16 %v252_v38, %v248_v37  ;;  %v251_v46 = vld [vmem:[#allocation4 + $0x230] sm:$0xff]  ;;  %v254_v47 = vld [vmem:[#allocation4 + $0x248] sm:$0xff] }
  0x2b   :  { %667 = vmatprep.subr.bf16.mxu1 %v666_v8  ;;  %605 = vmatpush1.bf16.msra.mxu0 %v604_v15  ;;  %v258_v48 = vld [vmem:[#allocation4 + $0x268] sm:$0xff]  ;;  %v256_v49 = vld [vmem:[#allocation4 + $0x258] sm:$0xff]  ;;  %v616_v51 = vpack.c.bf16 %v249_v42, %v245_v41  ;;  %v680_v52 = vpack.c.bf16 %v251_v46, %v247_v45  ;;  %v253_v53 = vld [vmem:[#allocation4 + $0x240] sm:$0xff] }
  0x2c   :  { %607 = vmatprep.subr.bf16.mxu0 %v606_v19  ;;  %v260_v50 = vld [vmem:[#allocation4 + $0x278] sm:$0xff]  ;;  %v257_v54 = vld [vmem:[#allocation4 + $0x260] sm:$0xff]  ;;  %v618_v55 = vpack.c.bf16 %v258_v48, %v254_v47  ;;  %v255_v57 = vld [vmem:[#allocation4 + $0x250] sm:$0xff] }
  0x2d   :  { %v682_v56 = vpack.c.bf16 %v260_v50, %v256_v49  ;;  %v259_v58 = vld [vmem:[#allocation4 + $0x270] sm:$0xff]  ;;  %v262_v59 = vld [vmem:[#allocation4 + $0x288] sm:$0xff]  ;;  %v264_v61 = vld [vmem:[#allocation4 + $0x298] sm:$0xff]  ;;  %v620_v63 = vpack.c.bf16 %v257_v54, %v253_v53 }
  0x2e   :  { %669 = vmatpush1.bf16.msra.mxu1 %v668_v16  ;;  %v266_v60 = vld [vmem:[#allocation4 + $0x2a8] sm:$0xff]  ;;  %v268_v62 = vld [vmem:[#allocation4 + $0x2b8] sm:$0xff]  ;;  %v684_v0 = vpack.c.bf16 %v259_v58, %v255_v57  ;;  %v261_v1 = vld [vmem:[#allocation4 + $0x280] sm:$0xff] }
  0x2f   :  { %671 = vmatprep.subr.bf16.mxu1 %v670_v20  ;;  %609 = vmatpush1.bf16.msra.mxu0 %v608_v27  ;;  %v265_v2 = vld [vmem:[#allocation4 + $0x2a0] sm:$0xff]  ;;  %v622_v3 = vpack.c.bf16 %v266_v60, %v262_v59  ;;  %v686_v4 = vpack.c.bf16 %v268_v62, %v264_v61  ;;  %v263_v5 = vld [vmem:[#allocation4 + $0x290] sm:$0xff]  ;;  %v270_v7 = vld [vmem:[#allocation4 + $0x2c8] sm:$0xff] }
  0x30   :  { %611 = vmatprep.subr.bf16.mxu0 %v610_v31  ;;  %v267_v6 = vld [vmem:[#allocation4 + $0x2b0] sm:$0xff]  ;;  %v274_v8 = vld [vmem:[#allocation4 + $0x2e8] sm:$0xff]  ;;  %v272_v9 = vld [vmem:[#allocation4 + $0x2d8] sm:$0xff]  ;;  %v624_v11 = vpack.c.bf16 %v265_v2, %v261_v1 }
  0x31   :  { %v276_v10 = vld [vmem:[#allocation4 + $0x2f8] sm:$0xff]  ;;  %v688_v12 = vpack.c.bf16 %v267_v6, %v263_v5  ;;  %v269_v13 = vld [vmem:[#allocation4 + $0x2c0] sm:$0xff]  ;;  %v626_v15 = vpack.c.bf16 %v274_v8, %v270_v7  ;;  %v271_v17 = vld [vmem:[#allocation4 + $0x2d0] sm:$0xff]  ;;  %v60_v5 = vlaneseq  ;;  %v49_v7 = vstv %s934_s0 }
  0x32   :  { %673 = vmatpush1.bf16.msra.mxu1 %v672_v28  ;;  %v273_v14 = vld [vmem:[#allocation4 + $0x2e0] sm:$0xff]  ;;  %v690_v16 = vpack.c.bf16 %v276_v10, %v272_v9  ;;  %v275_v18 = vld [vmem:[#allocation4 + $0x2f0] sm:$0xff]  ;;  %v278_v19 = vld [vmem:[#allocation4 + $0x308] sm:$0xff] }
  0x33   :  { %675 = vmatprep.subr.bf16.mxu1 %v674_v32  ;;  %613 = vmatpush1.bf16.msra.mxu0 %v612_v39  ;;  %v282_v20 = vld [vmem:[#allocation4 + $0x328] sm:$0xff]  ;;  %v280_v21 = vld [vmem:[#allocation4 + $0x318] sm:$0xff]  ;;  %v628_v23 = vpack.c.bf16 %v273_v14, %v269_v13  ;;  %v692_v24 = vpack.c.bf16 %v275_v18, %v271_v17  ;;  %v277_v25 = vld [vmem:[#allocation4 + $0x300] sm:$0xff]  ;;  %v837_v6 = vshrl.u32 %v60_v5, 7 }
  0x34   :  { %615 = vmatprep.subr.bf16.mxu0 %v614_v43  ;;  %v284_v22 = vld [vmem:[#allocation4 + $0x338] sm:$0xff]  ;;  %v281_v26 = vld [vmem:[#allocation4 + $0x320] sm:$0xff]  ;;  %v630_v27 = vpack.c.bf16 %v282_v20, %v278_v19  ;;  %v279_v29 = vld [vmem:[#allocation4 + $0x310] sm:$0xff] }
  0x35   :  { %v694_v28 = vpack.c.bf16 %v284_v22, %v280_v21  ;;  %v283_v30 = vld [vmem:[#allocation4 + $0x330] sm:$0xff]  ;;  %v286_v31 = vld [vmem:[#allocation4 + $0x348] sm:$0xff]  ;;  %v288_v33 = vld [vmem:[#allocation4 + $0x358] sm:$0xff]  ;;  %v632_v35 = vpack.c.bf16 %v281_v26, %v277_v25  ;;  %v846_v9 = vsub.s32 0, %v837_v6  ;;  %v849_v10 = vsub.s32 1, %v837_v6 }
  0x36   :  { %677 = vmatpush1.bf16.msra.mxu1 %v676_v40  ;;  %v290_v32 = vld [vmem:[#allocation4 + $0x368] sm:$0xff]  ;;  %v292_v34 = vld [vmem:[#allocation4 + $0x378] sm:$0xff]  ;;  %v696_v36 = vpack.c.bf16 %v283_v30, %v279_v29  ;;  %v285_v37 = vld [vmem:[#allocation4 + $0x340] sm:$0xff] }
  0x37   :  { %679 = vmatprep.subr.bf16.mxu1 %v678_v44  ;;  %617 = vmatpush1.bf16.msra.mxu0 %v616_v51  ;;  %v289_v38 = vld [vmem:[#allocation4 + $0x360] sm:$0xff]  ;;  %v634_v39 = vpack.c.bf16 %v290_v32, %v286_v31  ;;  %v698_v40 = vpack.c.bf16 %v292_v34, %v288_v33  ;;  %v287_v41 = vld [vmem:[#allocation4 + $0x350] sm:$0xff]  ;;  %v294_v43 = vld [vmem:[#allocation4 + $0x388] sm:$0xff] }
  0x38   :  { %619 = vmatprep.subr.bf16.mxu0 %v618_v55  ;;  %v291_v42 = vld [vmem:[#allocation4 + $0x370] sm:$0xff]  ;;  %v298_v44 = vld [vmem:[#allocation4 + $0x3a8] sm:$0xff]  ;;  %v296_v45 = vld [vmem:[#allocation4 + $0x398] sm:$0xff]  ;;  %v636_v47 = vpack.c.bf16 %v289_v38, %v285_v37 }
  0x39   :  { %v300_v46 = vld [vmem:[#allocation4 + $0x3b8] sm:$0xff]  ;;  %v700_v48 = vpack.c.bf16 %v291_v42, %v287_v41  ;;  %v293_v49 = vld [vmem:[#allocation4 + $0x380] sm:$0xff]  ;;  %v638_v51 = vpack.c.bf16 %v298_v44, %v294_v43  ;;  %v295_v53 = vld [vmem:[#allocation4 + $0x390] sm:$0xff] }
  0x3a   :  { %681 = vmatpush1.bf16.msra.mxu1 %v680_v52  ;;  %v297_v50 = vld [vmem:[#allocation4 + $0x3a0] sm:$0xff]  ;;  %v702_v52 = vpack.c.bf16 %v300_v46, %v296_v45  ;;  %v299_v54 = vld [vmem:[#allocation4 + $0x3b0] sm:$0xff]  ;;  %v302_v55 = vld [vmem:[#allocation4 + $0x3c8] sm:$0xff] }
  0x3b   :  { %683 = vmatprep.subr.bf16.mxu1 %v682_v56  ;;  %621 = vmatpush1.bf16.msra.mxu0 %v620_v63  ;;  %v306_v56 = vld [vmem:[#allocation4 + $0x3e8] sm:$0xff]  ;;  %v304_v57 = vld [vmem:[#allocation4 + $0x3d8] sm:$0xff]  ;;  %v640_v59 = vpack.c.bf16 %v297_v50, %v293_v49  ;;  %v704_v60 = vpack.c.bf16 %v299_v54, %v295_v53  ;;  %v301_v61 = vld [vmem:[#allocation4 + $0x3c0] sm:$0xff] }
  0x3c   :  { %623 = vmatprep.subr.bf16.mxu0 %v622_v3  ;;  %v308_v58 = vld [vmem:[#allocation4 + $0x3f8] sm:$0xff]  ;;  %v642_v62 = vpack.c.bf16 %v306_v56, %v302_v55  ;;  %v303_v1 = vld [vmem:[#allocation4 + $0x3d0] sm:$0xff]  ;;  %v578_v8 = vld [vmem:[%s936_s2 + $0x4] ss:$8 sm:$0x3] }
  0x3d   :  { %v706_v63 = vpack.c.bf16 %v308_v58, %v304_v57  ;;  %v307_v2 = vld [vmem:[#allocation4 + $0x3f0] sm:$0xff]  ;;  %v46_v13 = vld [vmem:[%s937_s3] sm:$0x3]  ;;  %v580_v19 = vld [vmem:[%s936_s2 + $0x2] ss:$8 sm:$0x3] }
  0x3e   :  { %685 = vmatpush1.bf16.msra.mxu1 %v684_v0  ;;  %v305_v0 = vld [vmem:[#allocation4 + $0x3e0] sm:$0xff]  ;;  %v120_v29 = vrot.slane %v580_v19, %v849_v10 }
  0x3f   :  { %687 = vmatprep.subr.bf16.mxu1 %v686_v4  ;;  %625 = vmatpush1.bf16.msra.mxu0 %v624_v11  ;;  %v644_v3 = vpack.c.bf16 %v305_v0, %v301_v61  ;;  %v708_v4 = vpack.c.bf16 %v307_v2, %v303_v1  ;;  %v50_v11 = vmul.f32 %v578_v8, %v49_v7  ;;  %v579_v17 = vld [vmem:[%s936_s2 + $0x1] ss:$8 sm:$0x3] }
  0x40   :  { %627 = vmatprep.subr.bf16.mxu0 %v626_v15  ;;  %v95_v21 = vrot.slane %v579_v17, %v846_v9  ;;  %v99_v22 = vrot.slane %v579_v17, %v849_v10  ;;  %v325_v17 = vsub.s32 3, %v837_v6 }
  0x42   :  { %689 = vmatpush1.bf16.msra.mxu1 %v688_v12  ;;  %v53_v12 = vld [vmem:[%s936_s2] ss:$8 sm:$0x3] }
  0x43   :  { %691 = vmatprep.subr.bf16.mxu1 %v690_v16  ;;  %629 = vmatpush1.bf16.msra.mxu0 %v628_v23  ;;  %v63_v14 = vrot.slane %v53_v12, %v846_v9  ;;  %v67_v15 = vrot.slane %v53_v12, %v849_v10  ;;  %v51_v16 = vadd.f32 %v50_v11, %v46_v13  ;;  %v581_v23 = vld [vmem:[%s936_s2 + $0x3] ss:$8 sm:$0x3] }
  0x44   :  { %631 = vmatprep.subr.bf16.mxu0 %v630_v27  ;;  %v137_v30 = vrot.slane %v581_v23, %v846_v9  ;;  %v141_v31 = vrot.slane %v581_v23, %v849_v10 }
  0x45   :  { %v76_v26 = vrot.slane %v51_v16, %v846_v9  ;;  %v80_v27 = vrot.slane %v51_v16, %v849_v10  ;;  %v309_v16 = vld [vmem:[%s939_s5] sm:$0xf] }
  0x46   :  { %693 = vmatpush1.bf16.msra.mxu1 %v692_v24 }
  0x47   :  { %695 = vmatprep.subr.bf16.mxu1 %v694_v28  ;;  %633 = vmatpush1.bf16.msra.mxu0 %v632_v35  ;;  %v116_v28 = vrot.slane %v580_v19, %v846_v9 }
  0x48   :  { %635 = vmatprep.subr.bf16.mxu0 %v634_v39 }
  0x4a   :  { %697 = vmatpush1.bf16.msra.mxu1 %v696_v36 }
  0x4b   :  { %699 = vmatprep.subr.bf16.mxu1 %v698_v40  ;;  %637 = vmatpush1.bf16.msra.mxu0 %v636_v47 }
  0x4c   :  { %639 = vmatprep.subr.bf16.mxu0 %v638_v51 }
  0x4e   :  { %701 = vmatpush1.bf16.msra.mxu1 %v700_v48 }
  0x4f   :  { %703 = vmatprep.subr.bf16.mxu1 %v702_v52  ;;  %641 = vmatpush1.bf16.msra.mxu0 %v640_v59 }
  0x50   :  { %643 = vmatprep.subr.bf16.mxu0 %v642_v62 }
  0x52   :  { %705 = vmatpush1.bf16.msra.mxu1 %v704_v60 }
  0x53   :  { %707 = vmatprep.subr.bf16.mxu1 %v706_v63  ;;  %645 = vmatpush1.bf16.msra.mxu0 %v644_v3 }
  0x56   :  { %709 = vmatpush1.bf16.msra.mxu1 %v708_v4 }
  0x93   :  { %v57_v18 = vpop.permute.xlu0 %56  ;;  %v110_v20 = vpop.permute.xlu1 %109 }
  0x94   :  { %v70_v24 = vmul.f32 %v63_v14, %v57_v18  ;;  %v71_v25 = vmul.f32 %v67_v15, %v57_v18  ;;  %v123_v38 = vmul.f32 %v116_v28, %v110_v20  ;;  %v124_v39 = vmul.f32 %v120_v29, %v110_v20 }
  0x95   :  { %v321_v15 = vsub.s32 2, %v837_v6  ;;  %v314_v18 = vrot.slane %v309_v16, %v846_v9  ;;  %v318_v20 = vrot.slane %v309_v16, %v849_v10 }
  0x96   :  { %v83_v34 = vadd.f32 %v76_v26, %v70_v24  ;;  %v84_v35 = vadd.f32 %v80_v27, %v71_v25 }
  0x97   :  { %v322_v19 = vrot.slane %v309_v16, %v321_v15 }
  0x98   :  { %v89_v32 = vpop.permute.xlu0 %88  ;;  %v131_v33 = vpop.permute.xlu1 %130 }
  0x99   :  { %v102_v36 = vmul.f32 %v95_v21, %v89_v32  ;;  %v103_v37 = vmul.f32 %v99_v22, %v89_v32  ;;  %v144_v42 = vmul.f32 %v137_v30, %v131_v33  ;;  %v145_v43 = vmul.f32 %v141_v31, %v131_v33 }
  0x9a   :  { %v326_v21 = vrot.slane %v309_v16, %v325_v17 }
  0x9b   :  { %v104_v40 = vadd.f32 %v102_v36, %v83_v34  ;;  %v105_v41 = vadd.f32 %v103_v37, %v84_v35 }
  0x9d   :  { %v125_v44 = vadd.f32 %v123_v38, %v104_v40  ;;  %v126_v45 = vadd.f32 %v124_v39, %v105_v41 }
  0x9f   :  { %v146_v46 = vadd.f32 %v144_v42, %v125_v44  ;;  %v147_v47 = vadd.f32 %v145_v43, %v126_v45 }
  0xa1   :  { %v148_v48 = vmul.f32 5.0, %v146_v46  ;;  %v149_v49 = vmul.f32 5.0, %v147_v47 }
  0xa3   :  { %v150_v50 = vmin.f32 %v148_v48, 20.0  ;;  %v151_v51 = vmin.f32 %v149_v49, 20.0  ;;  %vm177_vm2 = vcmp.gt.f32.partialorder %v148_v48, 20.0  ;;  %vm178_vm3 = vcmp.gt.f32.partialorder %v149_v49, 20.0 }
  0xa5   :  { %v152_v52 = vmul.f32 1.442695, %v150_v50  ;;  %v154_v53 = vmul.f32 1.442695, %v151_v51 }
  0xa7   :  { %722 = vpow2.f32 %v152_v52 }
  0xa8   :  { %724 = vpow2.f32 %v154_v53 }
  0xb1   :  { %v723_v54 = vpop.eup %722 }
  0xb2   :  { %v725_v55 = vpop.eup %724  ;;  %v156_v56 = vadd.f32 1.0, %v723_v54  ;;  %v159_v58 = vmul.f32 -0.5, %v723_v54  ;;  %v162_v62 = vand.u32 2147483647, %v723_v54 }
  0xb3   :  { %v165_v57 = vadd.f32 1.0, %v725_v55  ;;  %v168_v59 = vmul.f32 -0.5, %v725_v55  ;;  %v171_v63 = vand.u32 2147483647, %v725_v55 }
  0xb4   :  { %726 = vlog2.f32 %v156_v56  ;;  %v160_v60 = vadd.f32 1.0, %v159_v58  ;;  %vm163_vm0 = vcmp.lt.f32.partialorder %v162_v62, 0.0004427343 }
  0xb5   :  { %728 = vlog2.f32 %v165_v57  ;;  %v169_v61 = vadd.f32 1.0, %v168_v59  ;;  %vm172_vm1 = vcmp.lt.f32.partialorder %v171_v63, 0.0004427343 }
  0xb6   :  { %v161_v3 = vmul.f32 %v723_v54, %v160_v60  ;;  %v537_v54 = vld [vmem:[%s940_s6] sm:$0xf] }
  0xb7   :  { %v170_v5 = vmul.f32 %v725_v55, %v169_v61  ;;  %v542_v61 = vrot.slane %v537_v54, %v846_v9 }
  0xbe   :  { %v727_v0 = vpop.eup %726 }
  0xbf   :  { %v729_v1 = vpop.eup %728  ;;  %v158_v2 = vmul.f32 0.6931472, %v727_v0 }
  0xc0   :  { %v167_v4 = vmul.f32 0.6931472, %v729_v1 }
  0xc1   :  { %v164_v7 = vsel %vm163_vm0, %v161_v3, %v158_v2  ;;  %v546_v2 = vrot.slane %v537_v54, %v849_v10 }
  0xc2   :  { %v173_v8 = vsel %vm172_vm1, %v170_v5, %v167_v4  ;;  %v175_v11 = vmul.f32 0.2, %v164_v7 }
  0xc3   :  { %v176_v12 = vmul.f32 0.2, %v173_v8 }
  0xc4   :  { %v179_v13 = vsel %vm177_vm2, %v146_v46, %v175_v11 }
  0xc5   :  { %v180_v14 = vsel %vm178_vm3, %v147_v47, %v176_v12 }
  0xc6   :  { %395 = vmatprep.mubr.f32.mxu0 %v180_v14  ;;  %466 = vmatprep.mubr.f32.mxu1 %v180_v14 }
  0xc7   :  { %396 = vmatmul.mubr.f32.vlgmr.msra.gmra.mrb[0].mxu0 %v179_v13  ;;  %467 = vmatmul.mubr.f32.vlgmr.msra.gmra.mrb[0].mxu1 %v179_v13 }
 0x19a   :  { %v397_v22 = vpop.f32.mrb[0].mxu0  ;;  %v468_v23 = vpop.f32.mrb[0].mxu1 }
 0x19b   :  { %v887_v24 = vadd.f32 %v397_v22, %v314_v18  ;;  %v889_v25 = vadd.f32 %v468_v23, %v322_v19  ;;  %v399_v26 = vpop.f32.mrb[1].mxu0  ;;  %v470_v27 = vpop.f32.mrb[1].mxu1  ;;  %v550_v22 = vrot.slane %v537_v54, %v321_v15 }
 0x19c   :  { %v891_v28 = vadd.f32 %v399_v26, %v318_v20  ;;  %v893_v29 = vadd.f32 %v470_v27, %v326_v21 }
 0x19d   :  { %v896_v30 = vmul.f32 5.0, %v887_v24  ;;  %v899_v31 = vmul.f32 5.0, %v889_v25 }
 0x19e   :  { %v902_v32 = vmul.f32 5.0, %v891_v28  ;;  %v905_v33 = vmul.f32 5.0, %v893_v29 }
 0x19f   :  { %v477_v34 = vmin.f32 %v896_v30, 20.0  ;;  %v479_v35 = vmin.f32 %v899_v31, 20.0  ;;  %vm529_vm6 = vcmp.gt.f32.partialorder %v896_v30, 20.0  ;;  %vm531_vm9 = vcmp.gt.f32.partialorder %v899_v31, 20.0 }
 0x1a0   :  { %v478_v36 = vmin.f32 %v902_v32, 20.0  ;;  %v480_v37 = vmin.f32 %v905_v33, 20.0  ;;  %vm530_vm10 = vcmp.gt.f32.partialorder %v902_v32, 20.0  ;;  %vm532_vm11 = vcmp.gt.f32.partialorder %v905_v33, 20.0 }
 0x1a1   :  { %v481_v38 = vmul.f32 1.442695, %v477_v34  ;;  %v485_v39 = vmul.f32 1.442695, %v479_v35 }
 0x1a2   :  { %v483_v40 = vmul.f32 1.442695, %v478_v36  ;;  %v487_v41 = vmul.f32 1.442695, %v480_v37 }
 0x1a3   :  { %730 = vpow2.f32 %v481_v38 }
 0x1a4   :  { %732 = vpow2.f32 %v485_v39 }
 0x1a5   :  { %734 = vpow2.f32 %v483_v40 }
 0x1a6   :  { %736 = vpow2.f32 %v487_v41 }
 0x1ad   :  { %v731_v42 = vpop.eup %730 }
 0x1ae   :  { %v733_v43 = vpop.eup %732  ;;  %v489_v44 = vadd.f32 1.0, %v731_v42  ;;  %v492_v50 = vmul.f32 -0.5, %v731_v42  ;;  %v495_v56 = vand.u32 2147483647, %v731_v42 }
 0x1af   :  { %v735_v45 = vpop.eup %734  ;;  %v507_v46 = vadd.f32 1.0, %v733_v43  ;;  %v510_v51 = vmul.f32 -0.5, %v733_v43  ;;  %v513_v58 = vand.u32 2147483647, %v733_v43 }
 0x1b0   :  { %v737_v47 = vpop.eup %736  ;;  %738 = vlog2.f32 %v489_v44  ;;  %v498_v48 = vadd.f32 1.0, %v735_v45  ;;  %v501_v52 = vmul.f32 -0.5, %v735_v45  ;;  %v493_v53 = vadd.f32 1.0, %v492_v50 }
 0x1b1   :  { %740 = vlog2.f32 %v507_v46  ;;  %v516_v49 = vadd.f32 1.0, %v737_v47  ;;  %v519_v55 = vmul.f32 -0.5, %v737_v47  ;;  %v511_v57 = vadd.f32 1.0, %v510_v51 }
 0x1b2   :  { %742 = vlog2.f32 %v498_v48  ;;  %v502_v59 = vadd.f32 1.0, %v501_v52  ;;  %v504_v62 = vand.u32 2147483647, %v735_v45  ;;  %v494_v1 = vmul.f32 %v731_v42, %v493_v53 }
 0x1b3   :  { %744 = vlog2.f32 %v516_v49  ;;  %v520_v3 = vadd.f32 1.0, %v519_v55  ;;  %vm496_vm4 = vcmp.lt.f32.partialorder %v495_v56, 0.0004427343  ;;  %v512_v7 = vmul.f32 %v733_v43, %v511_v57 }
 0x1b4   :  { %v522_v8 = vand.u32 2147483647, %v737_v47  ;;  %vm514_vm5 = vcmp.lt.f32.partialorder %v513_v58, 0.0004427343  ;;  %v503_v13 = vmul.f32 %v735_v45, %v502_v59  ;;  %vm505_vm7 = vcmp.lt.f32.partialorder %v504_v62, 0.0004427343 }
 0x1b5   :  { %v521_v10 = vmul.f32 %v737_v47, %v520_v3 }
 0x1b6   :  { %vm523_vm8 = vcmp.lt.f32.partialorder %v522_v8, 0.0004427343 }
 0x1ba   :  { %v739_v60 = vpop.eup %738 }
 0x1bb   :  { %v741_v63 = vpop.eup %740  ;;  %v491_v0 = vmul.f32 0.6931472, %v739_v60 }
 0x1bc   :  { %v743_v4 = vpop.eup %742  ;;  %v509_v5 = vmul.f32 0.6931472, %v741_v63 }
 0x1bd   :  { %v497_v11 = vsel %vm496_vm4, %v494_v1, %v491_v0  ;;  %v500_v12 = vmul.f32 0.6931472, %v743_v4  ;;  %v745_v14 = vpop.eup %744 }
 0x1be   :  { %v525_v16 = vmul.f32 0.2, %v497_v11  ;;  %v515_v9 = vsel %vm514_vm5, %v512_v7, %v509_v5  ;;  %v518_v20 = vmul.f32 0.6931472, %v745_v14 }
 0x1bf   :  { %v527_v18 = vmul.f32 0.2, %v515_v9  ;;  %v506_v19 = vsel %vm505_vm7, %v503_v13, %v500_v12 }
 0x1c0   :  { %v533_v21 = vsel %vm529_vm6, %v887_v24, %v525_v16  ;;  %v526_v23 = vmul.f32 0.2, %v506_v19  ;;  %v524_v27 = vsel %vm523_vm8, %v521_v10, %v518_v20  ;;  %v554_v24 = vrot.slane %v537_v54, %v325_v17 }
 0x1c1   :  { %v559_v26 = vmul.f32 %v542_v61, %v533_v21  ;;  %v535_v30 = vsel %vm531_vm9, %v889_v25, %v527_v18  ;;  %v528_v35 = vmul.f32 0.2, %v524_v27  ;;  %v569_v25 = vstv %s941_s7 }
 0x1c2   :  { %v534_v34 = vsel %vm530_vm10, %v891_v28, %v526_v23  ;;  %v561_v37 = vmul.f32 %v550_v22, %v535_v30 }
 0x1c3   :  { %v560_v36 = vmul.f32 %v546_v2, %v534_v34  ;;  %v536_v15 = vsel %vm532_vm11, %v893_v29, %v528_v35 }
 0x1c4   :  { %v562_v39 = vmul.f32 %v554_v24, %v536_v15 }
 0x1c5   :  { %v563_v38 = vadd.f32 %v560_v36, %v559_v26 }
 0x1c7   :  { %v564_v31 = vadd.f32 %v563_v38, %v561_v37 }
 0x1c9   :  { %v565_v40 = vadd.f32 %v564_v31, %v562_v39 }
 0x1cb   :  { %566 = vadd.xlane.f32.xlu1 %v565_v40 }
 0x258   :  { %v567_v28 = vpop.xlane.xlu1 %566 }
 0x259   :  { %v570_v32 = vadd.f32 %v569_v25, %v567_v28 }
 0x25b   :  { %572 = vst.msk [vmem:[%s942_s8] sm:$0xff] %vm571_vm12, %v570_v32 }
 0x25c   :  { %577 = vsyncpa [#allocation5], 1 }

</bundles_post_ra>
